<compile_context>
chip_gen: v7x
topology: tpu7x:2x2x1
jax: 0.10.0
libtpu: 0.0.40
codegen_flags: <defaults>
</compile_context>

<pallas_src>
import functools

import jax
import jax.numpy as jnp
from jax.experimental import pallas as pl
from jax.experimental.pallas import tpu as pltpu

_LANE = 128


def _round_up(a, b):
    return -(-a // b) * b


def _causal_conv1d_kernel(x_ref, w_ref, b_ref, o_ref, win_ref, xcol_ref, *,
                          kernel_size, dilation, pad, pad_al, carry_halo):
    """One (batch n, C_out-tile co, L-tile l) grid step.  NCL layout, L on lanes.

    x_ref   : (1, C_in, TL)        current input L-tile (HBM dtype)
    w_ref   : (TCO, K*C_in)        taps flattened, pre-cast to compute dtype
    b_ref   : (TCO, 1)             f32 bias
    o_ref   : (1, TCO, TL)
    win_ref : (C_in, pad_al+TL)    VMEM window: [zeros | history(pad) | tile]
    xcol_ref: (K*C_in, TL)         VMEM im2col scratch
    """
    l = pl.program_id(2)
    C_in = x_ref.shape[1]
    TL = x_ref.shape[2]

    if pad > 0:
        @pl.when(l == 0)
        def _zero_halo():
            # Zero history at the start of each (n, co) == the causal left pad.
            win_ref[:, :pad_al] = jnp.zeros((C_in, pad_al), win_ref.dtype)

    # Cast once per tile, BEFORE any data movement.
    x_blk = x_ref[0].astype(win_ref.dtype)            # (C_in, TL)
    win_ref[:, pad_al:pad_al + TL] = x_blk            # lane-aligned store

    # im2col straight into VMEM scratch: one slice-store per tap, no concat.
    for k in range(kernel_size):
        start = pad_al - k * dilation
        xcol_ref[k * C_in:(k + 1) * C_in, :] = win_ref[:, start:start + TL]

    acc = jnp.dot(w_ref[...], xcol_ref[...],
                  preferred_element_type=jnp.float32)  # (TCO, TL), f32 acc
    acc = acc + b_ref[...]
    o_ref[0] = acc.astype(o_ref.dtype)

    if carry_halo:
        # Keep the last `pad` input columns for the next L-tile of this (n, co).
        # (Write-after-read on win_ref: program order is preserved.)
        win_ref[:, pad_al - pad:pad_al] = x_blk[:, TL - pad:]


def causal_conv1d(x, weight, bias, *, dilation=1, compute_dtype=None,
                  max_tile_l=1024, max_tile_co=256):
    """Causal 1-D conv matching the PyTorch module.

    Args:
      x:      (N, C_in, L)      -- PyTorch NCL layout
      weight: (C_out, C_in, K)  -- PyTorch Conv1d weight layout
      bias:   (C_out,)
      compute_dtype: optional matmul dtype (e.g. jnp.bfloat16 on v6e/v7x);
                     accumulation stays f32.
    Returns:
      (N, C_out, L)
    """
    N, C_in, L = x.shape
    C_out, c_in_w, K = weight.shape
    assert c_in_w == C_in
    pad = dilation * (K - 1)
    pad_al = _round_up(pad, _LANE) if pad > 0 else 0

    c_dtype = jnp.dtype(compute_dtype) if compute_dtype is not None else jnp.dtype(x.dtype)
    x_bytes = jnp.dtype(x.dtype).itemsize
    c_bytes = c_dtype.itemsize

    # ---- VMEM budget (per TPU generation) -----------------------------------
    try:
        vmem_cap = int(pltpu.get_tpu_info().vmem_capacity_bytes)
    except Exception:
        vmem_cap = 64 * 1024 * 1024            # conservative (v7x per-core)
    vmem_limit = max(32 * 1024 * 1024,
                     min(int(0.85 * vmem_cap), 100 * 1024 * 1024))
    tile_budget = int(0.6 * vmem_limit)

    # ---- choose the C_out tile ----------------------------------------------
    if C_out <= max_tile_co:
        TCO = C_out
    else:
        TCO = None
        for t in range(max_tile_co - max_tile_co % 8, 7, -8):
            if C_out % t == 0:
                TCO = t
                break
        if TCO is None:
            # TODO(synk): pad C_out when it has no multiple-of-8 divisor <= max_tile_co.
            TCO = C_out
    n_co = C_out // TCO

    def _footprint(tl):
        return (2 * C_in * tl * x_bytes            # x tile (double-buffered)
                + 2 * TCO * tl * x_bytes           # out tile (double-buffered)
                + 2 * TCO * K * C_in * c_bytes     # weight (double-buffered)
                + C_in * (pad_al + tl) * c_bytes   # window scratch
                + K * C_in * tl * c_bytes          # im2col scratch
                + TCO * tl * 4)                    # f32 accumulator

    # ---- choose the L tile ----------------------------------------------------
    if L <= max(max_tile_l, _LANE):
        # Single tile.  Short decode-style L is padded up to 128 so the output
        # last dim stays lane-dense (no masked vst).
        TL = max(L, _LANE)
    else:
        tl_cap = max(_LANE, (max_tile_l // _LANE) * _LANE)
        TL = tl_cap
        while TL > _LANE and _footprint(TL) > tile_budget:
            TL -= _LANE
        # Prefer a 128-multiple divisor of L: avoids the HBM pad + slice round trip.
        for cand in range(TL, _LANE - 1, -_LANE):
            if L % cand == 0:
                TL = cand
                break
        if pad > TL:
            # TODO(synk): multi-tile halo history for extreme dilation*(K-1).
            TL = _round_up(pad, _LANE)

    L_w = _round_up(L, TL)
    n_l = L_w // TL

    x_w = x
    if L_w != L:
        # Right-pad only; zeros on the right never influence causal outputs at
        # columns < L.  Padded output columns are sliced off below.
        x_w = jnp.pad(x, ((0, 0), (0, 0), (0, L_w - L)))

    # ---- repack weights once (wrapper-side, incl. compute-dtype cast) --------
    # Row block k pairs with the im2col slice shifted back by k*dilation, so the
    # taps are flipped: row (k*C_in + c) holds weight[:, c, K-1-k].
    w2 = jnp.transpose(weight[:, :, ::-1], (0, 2, 1)).reshape(C_out, K * C_in)
    w2 = w2.astype(c_dtype)
    b2 = bias.reshape(C_out, 1).astype(jnp.float32)

    kernel = functools.partial(
        _causal_conv1d_kernel,
        kernel_size=K, dilation=dilation, pad=pad, pad_al=pad_al,
        carry_halo=(n_l > 1 and pad > 0))

    out = pl.pallas_call(
        kernel,
        out_shape=jax.ShapeDtypeStruct((N, C_out, L_w), x.dtype),
        grid_spec=pltpu.PrefetchScalarGridSpec(
            num_scalar_prefetch=0,
            grid=(N, n_co, n_l),
            in_specs=[
                pl.BlockSpec((1, C_in, TL), lambda n, co, l: (n, 0, l)),
                # Constant block index across l -> weight/bias stay resident.
                pl.BlockSpec((TCO, K * C_in), lambda n, co, l: (co, 0)),
                pl.BlockSpec((TCO, 1), lambda n, co, l: (co, 0)),
            ],
            out_specs=pl.BlockSpec((1, TCO, TL), lambda n, co, l: (n, co, l)),
            scratch_shapes=[
                pltpu.VMEM((C_in, pad_al + TL), c_dtype),   # window (halo + tile)
                pltpu.VMEM((K * C_in, TL), c_dtype),        # im2col
            ],
        ),
        compiler_params=pltpu.CompilerParams(
            # N and C_out tiles are independent (megacore-shardable); the L-tile
            # axis carries the halo history so it must stay sequential.
            dimension_semantics=("parallel", "parallel", "arbitrary"),
            vmem_limit_bytes=vmem_limit),
    )(x_w, w2, b2)

    if L_w != L:
        out = out[:, :, :L]
    return out


def _reference_causal_conv1d(x, weight, bias, *, dilation=1):
    """Pure-JAX reference (lax.conv_general_dilated) for verification."""
    K = weight.shape[-1]
    pad = dilation * (K - 1)
    out = jax.lax.conv_general_dilated(
        x, weight,
        window_strides=(1,),
        padding=[(pad, 0)],
        rhs_dilation=(dilation,),
        dimension_numbers=("NCH", "OIH", "NCH"),
    )
    return out + bias[None, :, None]


if __name__ == "__main__":
    key = jax.random.PRNGKey(0)
    kx, kw, kb, kx2, kw2, kb2 = jax.random.split(key, 6)

    # --- Test 1: module-sized example (single L tile, L padded to lane width) --
    N, C_in, C_out, L, K, dilation = 2, 4, 8, 16, 3, 2
    fan_in = C_in * K
    bound = 1.0 / (fan_in ** 0.5)
    x = jax.random.normal(kx, (N, C_in, L), dtype=jnp.float32)
    weight = jax.random.uniform(kw, (C_out, C_in, K), jnp.float32, -bound, bound)
    bias = jax.random.uniform(kb, (C_out,), jnp.float32, -bound, bound)

    out = jax.block_until_ready(causal_conv1d(x, weight, bias, dilation=dilation))
    ref = _reference_causal_conv1d(x, weight, bias, dilation=dilation)
    assert out.shape == (N, C_out, L), out.shape
    assert jnp.allclose(out, ref, atol=1e-5, rtol=1e-5), \
        float(jnp.max(jnp.abs(out - ref)))

    # --- Test 2: multi-tile halo-carry path (TL=128, 2 tiles, no HBM padding) --
    L2 = 256
    x2 = jax.random.normal(kx2, (N, C_in, L2), dtype=jnp.float32)
    out2 = jax.block_until_ready(
        causal_conv1d(x2, weight, bias, dilation=dilation, max_tile_l=128))
    ref2 = _reference_causal_conv1d(x2, weight, bias, dilation=dilation)
    assert out2.shape == (N, C_out, L2), out2.shape
    assert jnp.allclose(out2, ref2, atol=1e-5, rtol=1e-5), \
        float(jnp.max(jnp.abs(out2 - ref2)))

    # --- Test 3: bf16 compute path (f32 accumulation), looser tolerance --------
    out3 = jax.block_until_ready(
        causal_conv1d(x2, weight, bias, dilation=dilation, max_tile_l=128,
                      compute_dtype=jnp.bfloat16))
    assert out3.shape == (N, C_out, L2), out3.shape
    assert jnp.allclose(out3, ref2, atol=5e-2, rtol=5e-2), \
        float(jnp.max(jnp.abs(out3 - ref2)))

    # --- Test 4: C_out tiling path (grid axis over output channels) ------------
    C_out2 = 16
    bound2 = 1.0 / (fan_in ** 0.5)
    weight2 = jax.random.uniform(kw2, (C_out2, C_in, K), jnp.float32, -bound2, bound2)
    bias2 = jax.random.uniform(kb2, (C_out2,), jnp.float32, -bound2, bound2)
    out4 = jax.block_until_ready(
        causal_conv1d(x2, weight2, bias2, dilation=dilation,
                      max_tile_l=128, max_tile_co=8))
    ref4 = _reference_causal_conv1d(x2, weight2, bias2, dilation=dilation)
    assert out4.shape == (N, C_out2, L2), out4.shape
    assert jnp.allclose(out4, ref4, atol=1e-5, rtol=1e-5), \
        float(jnp.max(jnp.abs(out4 - ref4)))

    print("KERNEL_OK")
</pallas_src>

<mosaic_0001>
module attributes {stable_mosaic.version = 11 : i64} {
  func.func @_causal_conv1d_kernel(%arg0: i32, %arg1: i32, %arg2: i32, %arg3: memref<1x4x128xf32, #tpu.memory_space<vmem>>, %arg4: memref<8x12xf32, #tpu.memory_space<vmem>>, %arg5: memref<8x1xf32, #tpu.memory_space<vmem>>, %arg6: memref<1x8x128xf32, #tpu.memory_space<vmem>>, %arg7: memref<4x256xf32, #tpu.memory_space<vmem>>, %arg8: memref<12x128xf32, #tpu.memory_space<vmem>>) attributes {dimension_semantics = [#tpu.dimension_semantics<parallel>, #tpu.dimension_semantics<parallel>, #tpu.dimension_semantics<arbitrary>], iteration_bounds = array<i64: 2, 1, 1>, scalar_prefetch = 0 : i64, scratch_operands = 2 : i64, tpu.core_type = #tpu.core_type<tc>, window_params = [{transform_indices = @transform_0, window_bounds = array<i64: 1, 4, 128>}, {transform_indices = @transform_1, window_bounds = array<i64: 8, 12>}, {transform_indices = @transform_2, window_bounds = array<i64: 8, 1>}, {transform_indices = @transform_3, window_bounds = array<i64: 1, 8, 128>}]} {
    %c0_i32 = arith.constant 0 : i32
    %0 = arith.cmpi eq, %arg2, %c0_i32 : i32
    %1 = arith.extui %0 : i1 to i32
    %c0_i32_0 = arith.constant 0 : i32
    %2 = arith.cmpi ne, %1, %c0_i32_0 : i32
    scf.if %2 {
      %cst_21 = arith.constant 0.000000e+00 : f32
      %21 = vector.broadcast %cst_21 : f32 to vector<4x128xf32>
      %c0_22 = arith.constant 0 : index
      %c0_23 = arith.constant 0 : index
      %22 = vector.load %arg7[%c0_22, %c0_23] : memref<4x256xf32, #tpu.memory_space<vmem>>, vector<4x128xf32>
      tpu.vector_store %arg7[%c0_22, %c0_23], %21 {strides = array<i32>} : memref<4x256xf32, #tpu.memory_space<vmem>>, vector<4x128xf32>,
    } else {
    }
    %c0 = arith.constant 0 : index
    %c0_1 = arith.constant 0 : index
    %c0_2 = arith.constant 0 : index
    %3 = vector.load %arg3[%c0, %c0_1, %c0_2] : memref<1x4x128xf32, #tpu.memory_space<vmem>>, vector<1x4x128xf32>
    %4 = vector.shape_cast %3 : vector<1x4x128xf32> to vector<4x128xf32>
    %c0_3 = arith.constant 0 : index
    %c128 = arith.constant 128 : index
    %5 = vector.load %arg7[%c0_3, %c128] : memref<4x256xf32, #tpu.memory_space<vmem>>, vector<4x128xf32>
    tpu.vector_store %arg7[%c0_3, %c128], %4 {strides = array<i32>} : memref<4x256xf32, #tpu.memory_space<vmem>>, vector<4x128xf32>,
    %c0_4 = arith.constant 0 : index
    %c128_5 = arith.constant 128 : index
    %6 = vector.load %arg7[%c0_4, %c128_5] : memref<4x256xf32, #tpu.memory_space<vmem>>, vector<4x128xf32>
    %c0_6 = arith.constant 0 : index
    %c0_7 = arith.constant 0 : index
    %7 = vector.load %arg8[%c0_6, %c0_7] : memref<12x128xf32, #tpu.memory_space<vmem>>, vector<4x128xf32>
    tpu.vector_store %arg8[%c0_6, %c0_7], %6 {strides = array<i32>} : memref<12x128xf32, #tpu.memory_space<vmem>>, vector<4x128xf32>,
    %c0_8 = arith.constant 0 : index
    %c126 = arith.constant 126 : index
    %8 = vector.load %arg7[%c0_8, %c126] : memref<4x256xf32, #tpu.memory_space<vmem>>, vector<4x128xf32>
    %c4 = arith.constant 4 : index
    %c0_9 = arith.constant 0 : index
    %9 = vector.load %arg8[%c4, %c0_9] : memref<12x128xf32, #tpu.memory_space<vmem>>, vector<4x128xf32>
    tpu.vector_store %arg8[%c4, %c0_9], %8 {strides = array<i32>} : memref<12x128xf32, #tpu.memory_space<vmem>>, vector<4x128xf32>,
    %c0_10 = arith.constant 0 : index
    %c124 = arith.constant 124 : index
    %10 = vector.load %arg7[%c0_10, %c124] : memref<4x256xf32, #tpu.memory_space<vmem>>, vector<4x128xf32>
    %c8 = arith.constant 8 : index
    %c0_11 = arith.constant 0 : index
    %11 = vector.load %arg8[%c8, %c0_11] : memref<12x128xf32, #tpu.memory_space<vmem>>, vector<4x128xf32>
    tpu.vector_store %arg8[%c8, %c0_11], %10 {strides = array<i32>} : memref<12x128xf32, #tpu.memory_space<vmem>>, vector<4x128xf32>,
    %c0_12 = arith.constant 0 : index
    %c0_13 = arith.constant 0 : index
    %12 = vector.load %arg4[%c0_12, %c0_13] : memref<8x12xf32, #tpu.memory_space<vmem>>, vector<8x12xf32>
    %c0_14 = arith.constant 0 : index
    %c0_15 = arith.constant 0 : index
    %13 = vector.load %arg8[%c0_14, %c0_15] : memref<12x128xf32, #tpu.memory_space<vmem>>, vector<12x128xf32>
    %cst = arith.constant dense<0.000000e+00> : vector<8x128xf32>
    %14 = tpu.matmul %12, %13, %cst {dimension_numbers = #tpu.dot_dimension_numbers<[1], [0], [0], [1], [0, 0, 1, 1], [], []>} : vector<8x12xf32>, vector<12x128xf32>, vector<8x128xf32> -> vector<8x128xf32>
    %c0_16 = arith.constant 0 : index
    %c0_17 = arith.constant 0 : index
    %15 = vector.load %arg5[%c0_16, %c0_17] : memref<8x1xf32, #tpu.memory_space<vmem>>, vector<8x1xf32>
    %16 = vector.broadcast %15 : vector<8x1xf32> to vector<8x128xf32>
    %17 = arith.addf %14, %16 : vector<8x128xf32>
    %c0_18 = arith.constant 0 : index
    %c0_19 = arith.constant 0 : index
    %c0_20 = arith.constant 0 : index
    %18 = vector.load %arg6[%c0_18, %c0_19, %c0_20] : memref<1x8x128xf32, #tpu.memory_space<vmem>>, vector<1x8x128xf32>
    %19 = vector.shape_cast %18 : vector<1x8x128xf32> to vector<8x128xf32>
    %20 = vector.shape_cast %17 : vector<8x128xf32> to vector<1x8x128xf32>
    tpu.vector_store %arg6[%c0_18, %c0_19, %c0_20], %20 {strides = array<i32>} : memref<1x8x128xf32, #tpu.memory_space<vmem>>, vector<1x8x128xf32>,
    return
  }
  func.func @transform_0(%arg0: i32, %arg1: i32, %arg2: i32) -> (i32, i32, i32) {
    %c0_i32 = arith.constant 0 : i32
    %c0_i32_0 = arith.constant 0 : i32
    return %arg0, %c0_i32, %arg2 : i32, i32, i32
  }
  func.func @transform_1(%arg0: i32, %arg1: i32, %arg2: i32) -> (i32, i32) {
    %c0_i32 = arith.constant 0 : i32
    %c0_i32_0 = arith.constant 0 : i32
    return %arg1, %c0_i32 : i32, i32
  }
  func.func @transform_2(%arg0: i32, %arg1: i32, %arg2: i32) -> (i32, i32) {
    %c0_i32 = arith.constant 0 : i32
    %c0_i32_0 = arith.constant 0 : i32
    return %arg1, %c0_i32 : i32, i32
  }
  func.func @transform_3(%arg0: i32, %arg1: i32, %arg2: i32) -> (i32, i32, i32) {
    %c0_i32 = arith.constant 0 : i32
    return %arg0, %arg1, %arg2 : i32, i32, i32
  }
}

</mosaic_0001>

<bundles_post_ra>
// kernel: tpu_custom_call.1
= control target key start
LH: loop header
LB: loop body
LE: loop exit
PB: predicated region body
PF: predicated region fallthrough
CT: control target
= control target key end

     0   :  { %8 = vsyncpa [#allocation5], 0  ;;  %s875_s0 = inlined_call_operand.vmem [shape: f32[2,4,128], index: 0, kind: input, shape index: {}]   ;;  %s876_s1 = inlined_call_operand.hbm [shape: f32[8,12], index: 1, kind: input, shape index: {}]   ;;  %s877_s2 = inlined_call_operand.vmem [shape: f32[8,1], index: 2, kind: input, shape index: {}]   ;;  %s878_s3 = inlined_call_operand.hbm [shape: f32[2,8,128], index: 3, kind: output, shape index: {}]  }
   0x1   :  { %9 = vsyncpa [#allocation6], 0 }
   0x2   :  { %11 = vsyncpa [#allocation6 + $0x1], 0  ;;  %s722_s12 = smov 0   ;;  %s724_s13 = smov 0  }
   0x3   :  { %s726_s14 = smov 0   ;;  %s728_s15 = smov 0  }
   0x4   :  { %s730_s16 = smov 0   ;;  %s732_s17 = smov 0  }
   0x5 LB: > { %s476_s18 = sadd.s32 4294967295, %s691_s17   ;;  %s477_s19 = sadd.s32 4294967294, %s691_s17   ;;  %s691_s17 = sphi %s732_s17, %s17_s17   ;;  %s687_s16 = sphi %s730_s16, %s896_s16   ;;  %s683_s15 = sphi %s728_s15, %s895_s15   ;;  %s679_s14 = sphi %s726_s14, %s894_s14   ;;  %s675_s13 = sphi %s724_s13, %s893_s13   ;;  %s671_s12 = sphi %s722_s12, %s892_s12  }
   0x6   : > { %s36_s20 = sadd.s32 1, %s687_s16  ;;  %s127_s21 = sadd.s32 1, %s679_s14 }
   0x7   : > { %p38_p0 = scmp.ge.s32.totalorder %s36_s20, 2  ;;  %p137_p1 = scmp.ne.s32.totalorder %s679_s14, %s675_s13 }
   0x8   : > { %p138_p2 = scmp.eq.s32.totalorder %s476_s18, 1  ;;  %p143_p3 = scmp.ne.s32.totalorder %s675_s13, %s671_s12 }
   0x9   : > { %s898_s20 = smov (%p38_p0, %s36_s20), 0  ;;  %p144_p5 = scmp.eq.s32.totalorder %s477_s19, 1 }
   0xa   : > { %p762_p4 = por %p138_p2, %p137_p1  ;;  %s120_s23 = ssub.s32 %s687_s16, %s898_s20 }
   0xb   : > { %p478_p6 = scmp.ge.s32.totalorder %s691_s17, 1  ;;  %p125_p7 = scmp.eq.s32.totalorder %s120_s23, 0 }
   0xc   : > { %s883_s22 = scalar_select %p762_p4, 1, 0 }
   0xd   : > { %p769_p8 = por %p144_p5, %p143_p3  ;;  %p151_p9 = scmp.lt.s32.totalorder %s691_s17, 3 }
   0xe   : > { %s775_s25 = scalar_select %p125_p7, %s679_s14, %s127_s21  }
   0xf   : > { %s884_s24 = scalar_select %p769_p8, 1, 0 }
  0x10   : > { %p777_p10 = pnand %p478_p6, %p151_p9  ;;  %p781_p11 = scmp.eq.s32.totalorder %s476_s18, 0 }
  0x11   : > { %s693_s28 = smov [#allocation4]   ;;  %s581_s6 = scalar_lea.hbm %s876_s1, 128 }
  0x12   : > { %s885_s26 = scalar_select %p777_p10, 1, 0 }
  0x13   : > { %s886_s27 = scalar_select %p781_p11, 1, 0 }
  0x14   : > { %p512_p12 = pneg %p777_p10  ;;  %s166_s29 = sshll.u32 %s693_s28, 4  ;;  %s167_s29 = int_to_ptr.vmem [resolvable:$true] %s166_s29 }
  0x15   : > { %p582_p0 = scmp.ne.s32.totalorder %s876_s1, %s581_s6  ;;  %p588_p5 = scmp.lt.u32.totalorder %s581_s6, %s876_s1 }
  0x16   : > { %p789_p13 = pnand %p781_p11, %p512_p12 }
  0x18   : > { %p583_p1 = pneg %p789_p13 }
  0x1a   : > { %p584_p2 = pnand %p583_p1, %p582_p0 }
  0x1c   : > { %p585_p3 = pneg %p584_p2 }
  0x1e   : > { %p590_p6 = pnand %p588_p5, %p585_p3 }
  0x20   : > { %593 = shalt.err (!%p590_p6)
}
  0x21   : > { %s594_s11 = scalar_lea.vmem %s167_s29, 128  ;;  %p602_p8 = scmp.lt.s32.totalorder %s167_s29, %s167_s29 }
  0x22   : > { %p595_p7 = scmp.ne.s32.totalorder %s167_s29, %s594_s11  ;;  %p603_p4 = scmp.lt.s32.totalorder %s594_s11, %s594_s11 }
  0x24   : > { %p597_p9 = pnand %p595_p7, %p583_p1  ;;  %p604_p11 = por %p603_p4, %p602_p8 }
  0x26   : > { %p598_p12 = pneg %p597_p9 }
  0x28   : > { %p605_p10 = pnand %p604_p11, %p598_p12 }
  0x2a   : > { %608 = shalt.err (!%p605_p10)
}
  0x2b   : > { %515 = dma.hbm_to_vmem [thread:$0]  (!%p789_p13), %s876_s1, 128, %s167_s29, [#allocation5]  }
  0x2c   : > { %p888_p0 = scmp.ne.s32.totalorder %s885_s26, 0 }
  0x2d   : > { %p889_p2 = scmp.ne.s32.totalorder (!%p888_p0), %s886_s27, 0 }
  0x2e   : > { %196 = sbr.rel (%p888_p0) target bundleno = 430 (0x1ae), region = 32 }
  0x35   : > { %662 = dma.done.wait (%p889_p2), [#allocation5], 128  }
  0x36   : > { %664 = vsyncadd (%p889_p2), [#allocation5], 4294967168  ;;  %p226_p4 = scmp.lt.s32.totalorder %s683_s15, 1  ;;  %v694_v0 = vmov 0.0   ;;  %v695_v2 = vmov 0.0|0.0   ;;  %s696_s26 = smov 4  }
  0x37   : > { %241 = vst [vmem:[#allocation2] sm:$0xf] %v694_v0  ;;  %502 = vmatprep.subr.bf16.mxu0 %v695_v2  ;;  %s697_s27 = smov 2   ;;  %vm698_vm0 = vmmov 0   ;;  %v271_v6 = vld [vmem:[%s877_s2] sm:$0xff]  ;;  %v699_v7 = vmov 0  }
  0x38   : > { %s227_s21 = scalar_select %p226_p4, %s683_s15, 1  ;;  %499 = vmatprep.mubr.msk.f32.mxu0 %vm698_vm0, %v694_v0  ;;  %579 = vset.pattern.permute.xlu0 %v699_v7  ;;  %vm264_vm1 = vcmask 31744   ;;  %vm253_vm2 = vcmask 15360   ;;  %vm281_vm3 = vcmask 1043456   ;;  %vm700_vm4 = vmmov 1   ;;  %v268_v17 = vld [vmem:[#allocation4] sm:$0xff] }
  0x39   : > { %vm504_vm5 = vmpackc.low %vm281_vm3, %vm700_vm4  ;;  %vm277_vm6 = vcmask 97280   ;;  %s223_s6 = sand.u32 1, %s675_s13   ;;  %s489_s8 = sshll.u32 %s683_s15, 7 }
  0x3a   : > { %s485_s23 = sshll.u32 %s227_s21, 2  ;;  %s484_s7 = sshll.u32 %s223_s6, 3 }
  0x3b   : > { %s232_s29 = scalar_lea.vmem %s875_s0, %s485_s23  ;;  %s225_s9 = scalar_lea.vmem [#allocation7], %s484_s7 }
  0x3c   : > { %v242_v1 = vld [vmem:[%s232_s29] sm:$0xf]  ;;  %s372_s10 = sshll.u32 %s225_s9, 4  ;;  %s828_s19 = scalar_lea.hbm %s878_s3, %s489_s8  ;;  %s830_s10 = int_to_ptr.vmem [resolvable:$true] %s372_s10 }
  0x3d   : > { %243 = vst [vmem:[#allocation2 + $0x4] sm:$0xf] %v242_v1  ;;  %s357_s21 = scalar_lea.sflag [#allocation6], %s223_s6  ;;  %s609_s23 = scalar_lea.vmem %s830_s10, 128 }
  0x3e   : > { %p610_p8 = scmp.ne.s32.totalorder %s830_s10, %s609_s23  ;;  %p890_p10 = scmp.ne.s32.totalorder %s883_s22, 0 }
  0x3f   : > { %s701_s15 = smov [#allocation7]  }
  0x40   : > { %p611_p11 = pnand %p610_p8, %p890_p10  ;;  %s613_s28 = sshll.u32 %s701_s15, 4  ;;  %s614_s28 = int_to_ptr.vmem [resolvable:$false] %s613_s28 }
  0x41   : > { %s615_s30 = scalar_lea.vmem %s614_s28, 256  ;;  %p616_p1 = scmp.lt.s32.totalorder %s830_s10, %s614_s28 }
  0x42   : > { %p612_p13 = pneg %p611_p11  ;;  %p617_p3 = scmp.lt.s32.totalorder %s615_s30, %s609_s23 }
  0x44   : > { %v257_v3 = vld [vmem:[#allocation2] sm:$0xff]  ;;  %p618_p5 = por %p617_p3, %p616_p1 }
  0x45   : > { %v244_v4 = vld [vmem:[#allocation2 + $0x4] sm:$0xf]  ;;  %260 = vrot.lane.b32.xlu1 %v257_v3, %s696_s26  ;;  %v259_v5 = vcombine.high %v257_v3, %v257_v3  ;;  %249 = vrot.lane.b32.xlu0 %v257_v3, %s697_s27 }
  0x46   : > { %245 = vst [vmem:[#allocation3] sm:$0xf] %v244_v4  ;;  %p619_p6 = pnand %p618_p5, %p612_p13 }
  0x49   : > { %262 = vrot.lane.b32.xlu1 %v259_v5, %s696_s26  ;;  %251 = vrot.lane.b32.xlu0 %v259_v5, %s697_s27 }
  0x4d   : > { %274 = vperm.xlu0 %579, %v271_v6  }
  0xb7   : > { %v261_v8 = vpop.permute.xlu1 %260  ;;  %v250_v9 = vpop.permute.xlu0 %249 }
  0xbb   : > { %v263_v10 = vpop.permute.xlu1 %262  ;;  %v252_v11 = vpop.permute.xlu0 %251 }
  0xbc   : > { %v265_v12 = vsel %vm264_vm1, %v261_v8, %v263_v10  ;;  %v254_v13 = vsel %vm253_vm2, %v250_v9, %v252_v11 }
  0xbd   : > { %267 = vst [vmem:[#allocation3 + $0x8] sm:$0xf] %v265_v12  ;;  %256 = vst [vmem:[#allocation3 + $0x4] sm:$0xf] %v254_v13 }
  0xc4   : > { %v269_v14 = vld [vmem:[#allocation3] sm:$0xff]  ;;  %v270_v15 = vld [vmem:[#allocation3 + $0x8] sm:$0xf] }
  0xc5   : > { %v503_v16 = vpack.c.bf16 %v270_v15, %v269_v14 }
  0xc7   : > { %505 = vmatpush3.bf16.msk.msra.mxu0 %vm504_vm5, %v503_v16 }
  0xca   : > { %500 = vmatmul.mubr.msk.f32.vlgmr.msra.gmra.mrb[0].mxu0 %vm277_vm6, %v268_v17 }
  0xcc   : > { %v275_v18 = vpop.permute.xlu0 %274 }
 0x19d   : > { %v351_v19 = vpop.f32.mrb[0].mxu0 }
 0x19e   : > { %v352_v20 = vadd.f32 %v351_v19, %v275_v18  ;;  %v501_v21 = vpop.f32.mrb[1].mxu0 }
 0x1a0   : > { %355 = vst [vmem:[%s225_s9] sm:$0xff] %v352_v20 }
 0x1a1   : > { %622 = shalt.err (!%p619_p6)
}
 0x1a2   : > { %s623_s29 = scalar_lea.hbm %s828_s19, 128  ;;  %s627_s4 = scalar_lea.hbm %s878_s3, 256 }
 0x1a3   : > { %p624_p7 = scmp.ne.s32.totalorder %s828_s19, %s623_s29  ;;  %p628_p0 = scmp.lt.u32.totalorder %s828_s19, %s878_s3 }
 0x1a4   : > { %p629_p2 = scmp.lt.u32.totalorder %s627_s4, %s623_s29  ;;  %p631_p8 = scmp.lt.u32.totalorder %s623_s29, %s828_s19 }
 0x1a5   : > { %p625_p9 = pnand %p624_p7, %p890_p10 }
 0x1a6   : > { %p630_p4 = por %p629_p2, %p628_p0 }
 0x1a7   : > { %p626_p12 = pneg %p625_p9 }
 0x1a8   : > { %p632_p11 = por %p631_p8, %p630_p4 }
 0x1aa   : > { %p633_p13 = pnand %p632_p11, %p626_p12 }
 0x1ac   : > { %636 = shalt.err (!%p633_p13)
}
 0x1ad   : > { %510 = dma.vmem_to_hbm [thread:$0]  (%p890_p10), %s830_s10, 128, %s828_s19, %s357_s21  }
 0x1ae PF: > { %p522_p1 = scmp.ge.s32.totalorder %s691_s17, 2  ;;  %s384_s7 = sand.u32 1, %s671_s12  }
 0x1af   : > { %p891_p3 = scmp.ne.s32.totalorder %s884_s24, 0  ;;  %s385_s8 = scalar_lea.sflag [#allocation6], %s384_s7 }
 0x1b1   : > { %p517_p5 = pnand %p522_p1, %p891_p3 }
 0x1b3   : > { %666 = dma.done.wait (!%p517_p5), %s385_s8, 128  }
 0x1b4   : > { %668 = vsyncadd (!%p517_p5), %s385_s8, 4294967168  ;;  %s17_s17 = sadd.s32 1, %s691_s17   ;;  %s892_s12 = smov %s675_s13 }
 0x1b5   : > { %p14_p6 = scmp.ge.s32.totalorder %s17_s17, 4   ;;  %s893_s13 = smov %s679_s14 }
 0x1b6   : > { %s894_s14 = smov %s775_s25  ;;  %s895_s15 = smov %s687_s16 }
 0x1b7   : > { %s896_s16 = smov %s898_s20  ;;  %16 = sbr.rel (!%p14_p6) target bundleno = 5 (0x5), region = 80 }
 0x1be   :  { %390 = vsyncpa [#allocation5], 1 }
 0x1bf   :  { %392 = vsyncpa [#allocation5 + $0x1], 1 }
 0x1c0   :  { %393 = vsyncpa [#allocation6], 1 }
 0x1c1   :  { %395 = vsyncpa [#allocation6 + $0x1], 1 }

</bundles_post_ra>
